<compile_context>
chip_gen: v5e
topology: v5e:2x2
jax: 0.10.0
libtpu: 0.0.40
codegen_flags: <defaults>
</compile_context>

<pallas_src>
import jax
import jax.numpy as jnp
from jax.experimental import pallas as pl
from jax.experimental.pallas import tpu as pltpu


def _mlp_kernel(x_ref, w1_ref, b1_ref, w2_ref, b2_ref, w3_ref, b3_ref, o_ref):
    # x_ref: (10, T)   weights: (out, in)   biases: (out, 1)   o_ref: (5, T)
    x = x_ref[...]

    h1 = jnp.dot(w1_ref[...], x, preferred_element_type=jnp.float32)
    h1 = jnp.maximum(h1 + b1_ref[...], 0.0)                     # (20, T)

    h2 = jnp.dot(w2_ref[...], h1, preferred_element_type=jnp.float32)
    h2 = jnp.maximum(h2 + b2_ref[...], 0.0)                     # (10, T)

    h3 = jnp.dot(w3_ref[...], h2, preferred_element_type=jnp.float32)
    h3 = jnp.maximum(h3 + b3_ref[...], 0.0)                     # (5, T)

    o_ref[...] = h3.astype(o_ref.dtype)


def _round_up(n, m):
    return ((n + m - 1) // m) * m


def mlp_forward(x, params, *, max_batch_tile=2048):
    """x: (B, 10) float32. params: w1(20,10) b1(20,1) w2(10,20) b2(10,1) w3(5,10) b3(5,1).

    Returns (B, 5) float32, matching relu(l3(relu(l2(relu(l1(x)))))) of the
    PyTorch Model.
    """
    w1, b1 = params["w1"], params["b1"]
    w2, b2 = params["w2"], params["b2"]
    w3, b3 = params["w3"], params["b3"]

    B = x.shape[0]
    # Batch tile: multiple of 128 lanes; big enough to amortize per-step
    # overhead, small enough that double-buffered tiles fit any VMEM window.
    tile_b = min(max_batch_tile, _round_up(B, 128))
    padded_b = _round_up(B, tile_b)
    n_tiles = padded_b // tile_b

    # One-time layout plumbing in the wrapper: (B, 10) -> (10, padded_B).
    x_t = jnp.zeros((10, padded_b), jnp.float32).at[:, :B].set(x.T)

    # Weights/biases: full-array, grid-invariant blocks (resident in VMEM).
    resident = lambda a: pl.BlockSpec(a.shape, lambda i: (0,) * a.ndim)

    flops = 2 * B * (10 * 20 + 20 * 10 + 10 * 5)
    weight_bytes = 4 * (20 * 10 + 10 * 20 + 5 * 10 + 20 + 10 + 5)
    bytes_accessed = 4 * B * (10 + 5) + weight_bytes

    out_t = pl.pallas_call(
        _mlp_kernel,
        out_shape=jax.ShapeDtypeStruct((5, padded_b), jnp.float32),
        grid=(n_tiles,),
        in_specs=[
            pl.BlockSpec((10, tile_b), lambda i: (0, i)),   # x tile streams
            resident(w1), resident(b1),
            resident(w2), resident(b2),
            resident(w3), resident(b3),
        ],
        out_specs=pl.BlockSpec((5, tile_b), lambda i: (0, i)),
        compiler_params=pltpu.CompilerParams(
            dimension_semantics=("parallel",),
        ),
        cost_estimate=pl.CostEstimate(
            flops=flops, transcendentals=0, bytes_accessed=bytes_accessed),
    )(x_t, w1, b1, w2, b2, w3, b3)

    # Back to (B, 5), dropping batch padding.
    return out_t[:, :B].T


def init_params(key):
    """Deterministic init mimicking PyTorch nn.Linear default (uniform +-1/sqrt(fan_in)).

    Weights stored in PyTorch layout (out_features, in_features); biases (out, 1).
    """
    dims = [(10, 20), (20, 10), (10, 5)]
    params = {}
    for i, (fan_in, fan_out) in enumerate(dims, start=1):
        key, kw, kb = jax.random.split(key, 3)
        bound = 1.0 / (fan_in ** 0.5)
        params[f"w{i}"] = jax.random.uniform(
            kw, (fan_out, fan_in), jnp.float32, minval=-bound, maxval=bound)
        params[f"b{i}"] = jax.random.uniform(
            kb, (fan_out, 1), jnp.float32, minval=-bound, maxval=bound)
    return params


if __name__ == "__main__":
    key = jax.random.PRNGKey(0)
    key, kx = jax.random.split(key)

    batch = 8
    x = jax.random.normal(kx, (batch, 10), dtype=jnp.float32)
    params = init_params(key)

    out = mlp_forward(x, params)
    jax.block_until_ready(out)

    # Reference check in plain JAX (PyTorch semantics: y = x @ W.T + b).
    h = jnp.maximum(x @ params["w1"].T + params["b1"][:, 0], 0.0)
    h = jnp.maximum(h @ params["w2"].T + params["b2"][:, 0], 0.0)
    ref = jnp.maximum(h @ params["w3"].T + params["b3"][:, 0], 0.0)

    assert out.shape == (batch, 5)
    assert jnp.allclose(out, ref, atol=1e-5, rtol=1e-5)

    print("KERNEL_OK")
</pallas_src>

<mosaic_0001>
module attributes {stable_mosaic.version = 11 : i64} {
  func.func @_mlp_kernel(%arg0: i32, %arg1: memref<10x128xf32, #tpu.memory_space<vmem>>, %arg2: memref<20x10xf32, #tpu.memory_space<vmem>>, %arg3: memref<20x1xf32, #tpu.memory_space<vmem>>, %arg4: memref<10x20xf32, #tpu.memory_space<vmem>>, %arg5: memref<10x1xf32, #tpu.memory_space<vmem>>, %arg6: memref<5x10xf32, #tpu.memory_space<vmem>>, %arg7: memref<5x1xf32, #tpu.memory_space<vmem>>, %arg8: memref<5x128xf32, #tpu.memory_space<vmem>>) attributes {dimension_semantics = [#tpu.dimension_semantics<parallel>], iteration_bounds = array<i64: 1>, scalar_prefetch = 0 : i64, scratch_operands = 0 : i64, tpu.core_type = #tpu.core_type<tc>, window_params = [{transform_indices = @transform_0, window_bounds = array<i64: 10, 128>}, {pipeline_mode = #tpu.pipeline_mode<synchronous>, transform_indices = @transform_1, window_bounds = array<i64: 20, 10>}, {pipeline_mode = #tpu.pipeline_mode<synchronous>, transform_indices = @transform_2, window_bounds = array<i64: 20, 1>}, {pipeline_mode = #tpu.pipeline_mode<synchronous>, transform_indices = @transform_3, window_bounds = array<i64: 10, 20>}, {pipeline_mode = #tpu.pipeline_mode<synchronous>, transform_indices = @transform_4, window_bounds = array<i64: 10, 1>}, {pipeline_mode = #tpu.pipeline_mode<synchronous>, transform_indices = @transform_5, window_bounds = array<i64: 5, 10>}, {pipeline_mode = #tpu.pipeline_mode<synchronous>, transform_indices = @transform_6, window_bounds = array<i64: 5, 1>}, {transform_indices = @transform_7, window_bounds = array<i64: 5, 128>}]} {
    %c0 = arith.constant 0 : index
    %c0_0 = arith.constant 0 : index
    %0 = vector.load %arg1[%c0, %c0_0] : memref<10x128xf32, #tpu.memory_space<vmem>>, vector<10x128xf32>
    %c0_1 = arith.constant 0 : index
    %c0_2 = arith.constant 0 : index
    %1 = vector.load %arg2[%c0_1, %c0_2] : memref<20x10xf32, #tpu.memory_space<vmem>>, vector<20x10xf32>
    %cst = arith.constant dense<0.000000e+00> : vector<20x128xf32>
    %2 = tpu.matmul %1, %0, %cst {dimension_numbers = #tpu.dot_dimension_numbers<[1], [0], [0], [1], [0, 0, 1, 1], [], []>} : vector<20x10xf32>, vector<10x128xf32>, vector<20x128xf32> -> vector<20x128xf32>
    %c0_3 = arith.constant 0 : index
    %c0_4 = arith.constant 0 : index
    %3 = vector.load %arg3[%c0_3, %c0_4] : memref<20x1xf32, #tpu.memory_space<vmem>>, vector<20x1xf32>
    %4 = vector.broadcast %3 : vector<20x1xf32> to vector<20x128xf32>
    %5 = arith.addf %2, %4 : vector<20x128xf32>
    %cst_5 = arith.constant 0.000000e+00 : f32
    %6 = vector.broadcast %cst_5 : f32 to vector<20x128xf32>
    %7 = arith.maximumf %5, %6 : vector<20x128xf32>
    %c0_6 = arith.constant 0 : index
    %c0_7 = arith.constant 0 : index
    %8 = vector.load %arg4[%c0_6, %c0_7] : memref<10x20xf32, #tpu.memory_space<vmem>>, vector<10x20xf32>
    %cst_8 = arith.constant dense<0.000000e+00> : vector<10x128xf32>
    %9 = tpu.matmul %8, %7, %cst_8 {dimension_numbers = #tpu.dot_dimension_numbers<[1], [0], [0], [1], [0, 0, 1, 1], [], []>} : vector<10x20xf32>, vector<20x128xf32>, vector<10x128xf32> -> vector<10x128xf32>
    %c0_9 = arith.constant 0 : index
    %c0_10 = arith.constant 0 : index
    %10 = vector.load %arg5[%c0_9, %c0_10] : memref<10x1xf32, #tpu.memory_space<vmem>>, vector<10x1xf32>
    %11 = vector.broadcast %10 : vector<10x1xf32> to vector<10x128xf32>
    %12 = arith.addf %9, %11 : vector<10x128xf32>
    %cst_11 = arith.constant 0.000000e+00 : f32
    %13 = vector.broadcast %cst_11 : f32 to vector<10x128xf32>
    %14 = arith.maximumf %12, %13 : vector<10x128xf32>
    %c0_12 = arith.constant 0 : index
    %c0_13 = arith.constant 0 : index
    %15 = vector.load %arg6[%c0_12, %c0_13] : memref<5x10xf32, #tpu.memory_space<vmem>>, vector<5x10xf32>
    %cst_14 = arith.constant dense<0.000000e+00> : vector<5x128xf32>
    %16 = tpu.matmul %15, %14, %cst_14 {dimension_numbers = #tpu.dot_dimension_numbers<[1], [0], [0], [1], [0, 0, 1, 1], [], []>} : vector<5x10xf32>, vector<10x128xf32>, vector<5x128xf32> -> vector<5x128xf32>
    %c0_15 = arith.constant 0 : index
    %c0_16 = arith.constant 0 : index
    %17 = vector.load %arg7[%c0_15, %c0_16] : memref<5x1xf32, #tpu.memory_space<vmem>>, vector<5x1xf32>
    %18 = vector.broadcast %17 : vector<5x1xf32> to vector<5x128xf32>
    %19 = arith.addf %16, %18 : vector<5x128xf32>
    %cst_17 = arith.constant 0.000000e+00 : f32
    %20 = vector.broadcast %cst_17 : f32 to vector<5x128xf32>
    %21 = arith.maximumf %19, %20 : vector<5x128xf32>
    %c0_18 = arith.constant 0 : index
    %c0_19 = arith.constant 0 : index
    %22 = vector.load %arg8[%c0_18, %c0_19] : memref<5x128xf32, #tpu.memory_space<vmem>>, vector<5x128xf32>
    tpu.vector_store %arg8[%c0_18, %c0_19], %21 {strides = array<i32>} : memref<5x128xf32, #tpu.memory_space<vmem>>, vector<5x128xf32>,
    return
  }
  func.func @transform_0(%arg0: i32) -> (i32, i32) {
    %c0_i32 = arith.constant 0 : i32
    %c0_i32_0 = arith.constant 0 : i32
    return %c0_i32, %arg0 : i32, i32
  }
  func.func @transform_1(%arg0: i32) -> (i32, i32) {
    %c0_i32 = arith.constant 0 : i32
    %c0_i32_0 = arith.constant 0 : i32
    %c0_i32_1 = arith.constant 0 : i32
    return %c0_i32, %c0_i32_0 : i32, i32
  }
  func.func @transform_2(%arg0: i32) -> (i32, i32) {
    %c0_i32 = arith.constant 0 : i32
    %c0_i32_0 = arith.constant 0 : i32
    %c0_i32_1 = arith.constant 0 : i32
    return %c0_i32, %c0_i32_0 : i32, i32
  }
  func.func @transform_3(%arg0: i32) -> (i32, i32) {
    %c0_i32 = arith.constant 0 : i32
    %c0_i32_0 = arith.constant 0 : i32
    %c0_i32_1 = arith.constant 0 : i32
    return %c0_i32, %c0_i32_0 : i32, i32
  }
  func.func @transform_4(%arg0: i32) -> (i32, i32) {
    %c0_i32 = arith.constant 0 : i32
    %c0_i32_0 = arith.constant 0 : i32
    %c0_i32_1 = arith.constant 0 : i32
    return %c0_i32, %c0_i32_0 : i32, i32
  }
  func.func @transform_5(%arg0: i32) -> (i32, i32) {
    %c0_i32 = arith.constant 0 : i32
    %c0_i32_0 = arith.constant 0 : i32
    %c0_i32_1 = arith.constant 0 : i32
    return %c0_i32, %c0_i32_0 : i32, i32
  }
  func.func @transform_6(%arg0: i32) -> (i32, i32) {
    %c0_i32 = arith.constant 0 : i32
    %c0_i32_0 = arith.constant 0 : i32
    %c0_i32_1 = arith.constant 0 : i32
    return %c0_i32, %c0_i32_0 : i32, i32
  }
  func.func @transform_7(%arg0: i32) -> (i32, i32) {
    %c0_i32 = arith.constant 0 : i32
    %c0_i32_0 = arith.constant 0 : i32
    return %c0_i32, %arg0 : i32, i32
  }
}

</mosaic_0001>

<bundles_post_ra>
// kernel: tpu_custom_call.1
= control target key start
LH: loop header
LB: loop body
LE: loop exit
PB: predicated region body
PF: predicated region fallthrough
CT: control target
= control target key end

     0   :  { %vm60_vm0 = vcmask 1041408   ;;  %vm50_vm1 = vcmask 80896   ;;  %v239_v4 = vmov 0   ;;  %s333_s0 = inlined_call_operand.vmem [shape: f32[10,128], index: 0, kind: input, shape index: {}]   ;;  %s334_s1 = inlined_call_operand.vmem [shape: f32[20,10], index: 1, kind: input, shape index: {}]   ;;  %s335_s2 = inlined_call_operand.vmem [shape: f32[20,1], index: 2, kind: input, shape index: {}]   ;;  %s336_s3 = inlined_call_operand.vmem [shape: f32[10,20], index: 3, kind: input, shape index: {}]   ;;  %s337_s4 = inlined_call_operand.vmem [shape: f32[10,1], index: 4, kind: input, shape index: {}]   ;;  %s338_s5 = inlined_call_operand.vmem [shape: f32[5,10], index: 5, kind: input, shape index: {}]   ;;  %s339_s6 = inlined_call_operand.vmem [shape: f32[5,1], index: 6, kind: input, shape index: {}]   ;;  %s340_s7 = inlined_call_operand.hbm [shape: f32[5,128], index: 7, kind: output, shape index: {}]  }
   0x1   :  { %v28_v0 = vld [vmem:[%s333_s0 + $0x8] sm:$0x3]  ;;  %v27_v1 = vld [vmem:[%s333_s0] sm:$0xff]  ;;  %v34_v3 = vld [vmem:[%s335_s2 + $0x10] sm:$0xf]  ;;  %210 = vset.pattern.permute.xlu0 %v239_v4  ;;  %211 = vset.pattern.permute.xlu1 %v239_v4 }
   0x2   :  { %203 = vmatpush.msk.msra.mxu3 %vm60_vm0, %v28_v0  ;;  %v30_v2 = vld [vmem:[%s334_s1 + $0x8] sm:$0xff]  ;;  %194 = vmatpush.msk.msra.mxu0 %vm60_vm0, %v28_v0  ;;  %v29_v5 = vld [vmem:[%s334_s1] sm:$0xff] }
   0x3   :  { %v32_v6 = vld [vmem:[%s335_s2] sm:$0xff]  ;;  %47 = vperm.xlu0 %210, %v34_v3  }
   0x4   :  { %204 = vmatpush.msra.mxu3 %v27_v1 }
   0x5   :  { %12 = vsyncpa [#allocation3], 0  ;;  %196 = vmatmul.msk.f32.vlgmr.msra.gmra.mxu3 %vm50_vm1, %v30_v2  ;;  %79 = vmatpush.msra.mxu0 %v27_v1  ;;  %v33_v7 = vld [vmem:[%s335_s2 + $0x8] sm:$0xff]  ;;  %v31_v8 = vld [vmem:[%s334_s1 + $0x10] sm:$0xf]  ;;  %vm114_vm2 = vcmask 1043456  }
   0x6   :  { %195 = vmatmul.msk.f32.vlgmr.msra.gmra.mxu0 %vm50_vm1, %v29_v5  ;;  %37 = vperm.xlu1 %211, %v32_v6   ;;  %v96_v9 = vld [vmem:[%s337_s4 + $0x8] sm:$0x3]  ;;  %v95_v10 = vld [vmem:[%s337_s4] sm:$0xff]  ;;  %vm107_vm3 = vcmask 162816   ;;  %s185_s27 = sshll.u32 %s340_s7, 4  ;;  %s186_s27 = int_to_ptr.hbm [resolvable:$true] %s185_s27 }
   0x7   :  { %212 = vset.pattern.permute.xlu2 %v239_v4  ;;  %v144_v11 = vld [vmem:[%s339_s6] sm:$0x1f]  ;;  %v94_v24 = vld [vmem:[%s336_s3 + $0x8] sm:$0x3] }
   0x8   :  { %99 = vperm.xlu2 %212, %v95_v10   ;;  %v93_v25 = vld [vmem:[%s336_s3] sm:$0xff]  ;;  %s240_s3 = smov [#allocation2]  }
   0x9   :  { %v143_v34 = vld [vmem:[%s338_s5] sm:$0x1f]  ;;  %s183_s24 = sshll.u32 %s240_s3, 4  ;;  %s184_s24 = int_to_ptr.vmem [resolvable:$true] %s183_s24 }
   0xb   :  { %42 = vperm.xlu0 %210, %v33_v7  }
   0xd   :  { %197 = vmatmul.msk.f32.gmra.mxu3 %vm50_vm1, %v31_v8 }
   0xe   :  { %104 = vperm.xlu1 %211, %v96_v9  }
  0x10   :  { %147 = vperm.xlu2 %212, %v144_v11  }
  0x62   :  { %v100_v27 = vpop.permute.xlu2 %99 }
  0x6a   :  { %v148_v35 = vpop.permute.xlu2 %147 }
  0x75   :  { %v48_v12 = vpop.permute.xlu0 %47 }
  0x78   :  { %v38_v16 = vpop.permute.xlu1 %37 }
  0x7d   :  { %v43_v14 = vpop.permute.xlu0 %42 }
  0x80   :  { %v105_v26 = vpop.permute.xlu1 %104 }
  0x83   :  { %v81_v15 = vpop.f32.mrf.mxu0 }
  0x84   :  { %v82_v20 = vadd.f32 %v81_v15, %v38_v16 }
  0x86   :  { %v90_v23 = vmax.f32 %v82_v20, 0.0 }
  0x88   :  { %v84_v13 = vpop.f32.mrf.mxu3 }
  0x89   :  { %v85_v18 = vadd.f32 %v84_v13, %v43_v14 }
  0x8b   :  { %v91_v22 = vmax.f32 %v85_v18, 0.0 }
  0x90   :  { %v87_v17 = vpop.f32.mrf.mxu3 }
  0x91   :  { %v88_v19 = vadd.f32 %v87_v17, %v48_v12 }
  0x93   :  { %v92_v21 = vmax.f32 %v88_v19, 0.0 }
  0x95   :  { %198 = vmatpush.msk.msrb.mxu0 %vm114_vm2, %v92_v21  ;;  %205 = vmatpush.msk.msra.mxu1 %vm114_vm2, %v92_v21 }
  0x97   :  { %132 = vmatpush.msrb.mxu0 %v91_v22  ;;  %206 = vmatpush.msra.mxu1 %v91_v22 }
  0x99   :  { %207 = vmatpush.msra.mxu1 %v90_v23  ;;  %133 = vmatpush.msrb.mxu0 %v90_v23 }
  0x9a   :  { %200 = vmatmul.msk.f32.vlgmr.msra.gmra.mxu1 %vm107_vm3, %v94_v24  ;;  %199 = vmatmul.msk.f32.vlgmr.msrb.gmra.mxu0 %vm107_vm3, %v93_v25 }
 0x117   :  { %v138_v28 = vpop.f32.mrf.mxu1  ;;  %v135_v29 = vpop.f32.mrf.mxu0 }
 0x118   :  { %v139_v30 = vadd.f32 %v138_v28, %v105_v26  ;;  %v136_v31 = vadd.f32 %v135_v29, %v100_v27 }
 0x11a   :  { %v142_v32 = vmax.f32 %v139_v30, 0.0  ;;  %v141_v33 = vmax.f32 %v136_v31, 0.0 }
 0x11c   :  { %201 = vmatpush.msk.msra.mxu2 %vm60_vm0, %v142_v32 }
 0x11e   :  { %171 = vmatpush.msra.mxu2 %v141_v33 }
 0x11f   :  { %202 = vmatmul.msk.f32.vlgmr.msra.gmra.mxu2 %vm50_vm1, %v143_v34 }
 0x1a2   :  { %v173_v36 = vpop.f32.mrf.mxu2 }
 0x1a3   :  { %v174_v37 = vadd.f32 %v173_v36, %v148_v35 }
 0x1a5   :  { %v176_v38 = vmax.f32 %v174_v37, 0.0 }
 0x1a7   :  { %177 = vst [vmem:[#allocation2] sm:$0x1f] %v176_v38 }
 0x1a8   :  { %188 = dma.vmem_to_hbm [thread:$0]  %s184_s24, 128, %s186_s27, [#allocation3]  }
 0x1a9   :  { %237 = dma.done.wait [#allocation3], 128  }
 0x1aa   :  { %238 = vsyncadd [#allocation3], 4294967168 }
 0x1ab   :  { %193 = vsyncpa [#allocation3], 1 }

</bundles_post_ra>
